<compile_context>
chip_gen: v5e
topology: v5e:2x2
jax: 0.10.0
libtpu: 0.0.40
codegen_flags: <defaults>
</compile_context>

<pallas_src>
import functools

import jax
import jax.numpy as jnp
from jax.experimental import pallas as pl
from jax.experimental.pallas import tpu as pltpu


def _round_up(x, m):
    return (x + m - 1) // m * m


def vae_forward_kernel(x_ref, eps_ref,
                       w_enc_ref, b_enc_ref,
                       w_mulv_ref, b_mulv_ref,
                       w_d1_ref, b_d1_ref,
                       w_d2_ref, b_d2_ref,
                       out_ref, mu_ref, logvar_ref,
                       *, latent_pad):
    # encoder: Linear(input, hidden) + ReLU  (bf16 operands, f32 accumulation)
    x = x_ref[...]
    h = jnp.dot(x, w_enc_ref[...], preferred_element_type=jnp.float32) + b_enc_ref[...]
    h = jnp.maximum(h, 0.0)

    # fused fc_mu / fc_logvar: single (hidden, 2*latent_pad) matmul, static split
    mulv = jnp.dot(h.astype(jnp.bfloat16), w_mulv_ref[...],
                   preferred_element_type=jnp.float32) + b_mulv_ref[...]
    mu = mulv[:, :latent_pad]
    logvar = mulv[:, latent_pad:]

    # reparameterize (f32): z = mu + eps * exp(0.5 * logvar)
    std = jnp.exp(0.5 * logvar)
    z = mu + eps_ref[...] * std

    # decoder: Linear(latent, hidden) + ReLU, Linear(hidden, input) + Sigmoid
    d = jnp.dot(z.astype(jnp.bfloat16), w_d1_ref[...],
                preferred_element_type=jnp.float32) + b_d1_ref[...]
    d = jnp.maximum(d, 0.0)
    logits = jnp.dot(d.astype(jnp.bfloat16), w_d2_ref[...],
                     preferred_element_type=jnp.float32) + b_d2_ref[...]
    # sigmoid via exp + approx reciprocal -> both land on the EUP slot
    out = pl.reciprocal(1.0 + jnp.exp(-logits), approx=True)

    out_ref[...] = out.astype(out_ref.dtype)
    mu_ref[...] = mu.astype(mu_ref.dtype)
    logvar_ref[...] = logvar.astype(logvar_ref.dtype)


@functools.partial(jax.jit, static_argnames=("tile_b",))
def vae_forward(x, eps, params, *, tile_b=128):
    B, input_dim = x.shape
    hidden_dim = params["w_enc"].shape[1]
    latent_dim = params["w_mu"].shape[1]

    # ---- padded (lane/sublane aligned) shapes ----
    d_in = _round_up(input_dim, 128)
    d_h = _round_up(hidden_dim, 128)
    d_lat = _round_up(latent_dim, 128)
    tile_b = _round_up(max(8, min(tile_b, _round_up(B, 8))), 8)
    b_pad = _round_up(B, tile_b)

    def pad2(a, rows, cols, dtype):
        z = jnp.zeros((rows, cols), dtype)
        return z.at[:a.shape[0], :a.shape[1]].set(a.astype(dtype))

    # activations / weights in bf16 (f32 accumulate in-kernel); eps/biases in f32
    x_p = pad2(x, b_pad, d_in, jnp.bfloat16)
    eps_p = pad2(eps, b_pad, d_lat, jnp.float32)

    w_enc = pad2(params["w_enc"], d_in, d_h, jnp.bfloat16)
    b_enc = pad2(params["b_enc"], 1, d_h, jnp.float32)
    w_mulv = jnp.concatenate(
        [pad2(params["w_mu"], d_h, d_lat, jnp.bfloat16),
         pad2(params["w_lv"], d_h, d_lat, jnp.bfloat16)], axis=1)
    b_mulv = jnp.concatenate(
        [pad2(params["b_mu"], 1, d_lat, jnp.float32),
         pad2(params["b_lv"], 1, d_lat, jnp.float32)], axis=1)
    w_d1 = pad2(params["w_d1"], d_lat, d_h, jnp.bfloat16)
    b_d1 = pad2(params["b_d1"], 1, d_h, jnp.float32)
    w_d2 = pad2(params["w_d2"], d_h, d_in, jnp.bfloat16)
    b_d2 = pad2(params["b_d2"], 1, d_in, jnp.float32)

    grid = (b_pad // tile_b,)

    def tile_spec(shape):          # batch-tiled arrays
        return pl.BlockSpec(shape, lambda i: (i, 0))

    def resident_spec(shape):      # weights/biases: same block every step (DMA'd once)
        return pl.BlockSpec(shape, lambda i: (0, 0))

    in_specs = [
        tile_spec((tile_b, d_in)),        # x
        tile_spec((tile_b, d_lat)),       # eps
        resident_spec((d_in, d_h)),       # w_enc
        resident_spec((1, d_h)),          # b_enc
        resident_spec((d_h, 2 * d_lat)),  # w_mulv (fused mu|logvar)
        resident_spec((1, 2 * d_lat)),    # b_mulv
        resident_spec((d_lat, d_h)),      # w_d1
        resident_spec((1, d_h)),          # b_d1
        resident_spec((d_h, d_in)),       # w_d2
        resident_spec((1, d_in)),         # b_d2
    ]
    out_specs = (
        tile_spec((tile_b, d_in)),        # reconstruction
        tile_spec((tile_b, d_lat)),       # mu
        tile_spec((tile_b, d_lat)),       # logvar
    )
    out_shapes = (
        jax.ShapeDtypeStruct((b_pad, d_in), jnp.float32),
        jax.ShapeDtypeStruct((b_pad, d_lat), jnp.float32),
        jax.ShapeDtypeStruct((b_pad, d_lat), jnp.float32),
    )

    flops = 2 * b_pad * (d_in * d_h + d_h * (2 * d_lat) + d_lat * d_h + d_h * d_in)
    transcendentals = b_pad * (d_lat + d_in)
    bytes_accessed = (
        x_p.size * 2 + eps_p.size * 4
        + (w_enc.size + w_mulv.size + w_d1.size + w_d2.size) * 2
        + (b_enc.size + b_mulv.size + b_d1.size + b_d2.size) * 4
        + b_pad * (d_in + 2 * d_lat) * 4)

    out_p, mu_p, lv_p = pl.pallas_call(
        functools.partial(vae_forward_kernel, latent_pad=d_lat),
        out_shape=out_shapes,
        grid=grid,
        in_specs=in_specs,
        out_specs=out_specs,
        compiler_params=pltpu.CompilerParams(
            dimension_semantics=("parallel",),   # megacore shards batch tiles on v7x
            vmem_limit_bytes=64 * 1024 * 1024),
        cost_estimate=pl.CostEstimate(
            flops=flops,
            transcendentals=transcendentals,
            bytes_accessed=bytes_accessed),
    )(x_p, eps_p, w_enc, b_enc, w_mulv, b_mulv, w_d1, b_d1, w_d2, b_d2)

    # slice off batch/feature padding (fuses under jit)
    return (out_p[:B, :input_dim],
            mu_p[:B, :latent_dim],
            lv_p[:B, :latent_dim])


def init_params(key, input_dim, latent_dim, hidden_dim):
    ks = jax.random.split(key, 5)
    scale = 0.1

    def lin(k, fan_in, fan_out):
        w = (scale * jax.random.normal(k, (fan_in, fan_out))).astype(jnp.float32)
        b = jnp.zeros((1, fan_out), jnp.float32)
        return w, b

    w_enc, b_enc = lin(ks[0], input_dim, hidden_dim)
    w_mu, b_mu = lin(ks[1], hidden_dim, latent_dim)
    w_lv, b_lv = lin(ks[2], hidden_dim, latent_dim)
    w_d1, b_d1 = lin(ks[3], latent_dim, hidden_dim)
    w_d2, b_d2 = lin(ks[4], hidden_dim, input_dim)

    return dict(w_enc=w_enc, b_enc=b_enc, w_mu=w_mu, b_mu=b_mu,
                w_lv=w_lv, b_lv=b_lv, w_d1=w_d1, b_d1=b_d1,
                w_d2=w_d2, b_d2=b_d2)


def vae_forward_ref(x, eps, p):
    # pure-f32 JAX reference (kernel uses bf16 matmul inputs -> loose tolerance)
    h = jnp.maximum(x @ p["w_enc"] + p["b_enc"], 0.0)
    mu = h @ p["w_mu"] + p["b_mu"]
    logvar = h @ p["w_lv"] + p["b_lv"]
    z = mu + eps * jnp.exp(0.5 * logvar)
    d = jnp.maximum(z @ p["w_d1"] + p["b_d1"], 0.0)
    out = jax.nn.sigmoid(d @ p["w_d2"] + p["b_d2"])
    return out, mu, logvar


if __name__ == "__main__":
    # small shapes consistent with the module; B > TILE_B so the grid has >1 step
    B, input_dim, latent_dim, hidden_dim = 256, 16, 8, 32

    key = jax.random.PRNGKey(0)
    k_x, k_eps, k_params = jax.random.split(key, 3)

    x = jax.random.uniform(k_x, (B, input_dim), dtype=jnp.float32)
    # eps for the reparameterization trick (torch.randn_like equivalent),
    # generated deterministically outside the kernel.
    eps = jax.random.normal(k_eps, (B, latent_dim), dtype=jnp.float32)

    params = init_params(k_params, input_dim, latent_dim, hidden_dim)

    out, mu, logvar = vae_forward(x, eps, params, tile_b=128)
    jax.block_until_ready((out, mu, logvar))

    # sanity check against pure-JAX f32 reference (kernel matmuls are bf16-in/f32-acc)
    ref_out, ref_mu, ref_lv = vae_forward_ref(x, eps, params)
    assert jnp.allclose(out, ref_out, atol=5e-2), jnp.max(jnp.abs(out - ref_out))
    assert jnp.allclose(mu, ref_mu, atol=5e-2), jnp.max(jnp.abs(mu - ref_mu))
    assert jnp.allclose(logvar, ref_lv, atol=5e-2), jnp.max(jnp.abs(logvar - ref_lv))

    print("KERNEL_OK")
</pallas_src>

<mosaic_0001>
module attributes {stable_mosaic.version = 11 : i64} {
  func.func @vae_forward_kernel(%arg0: i32, %arg1: memref<128x128xbf16, #tpu.memory_space<vmem>>, %arg2: memref<128x128xf32, #tpu.memory_space<vmem>>, %arg3: memref<128x128xbf16, #tpu.memory_space<vmem>>, %arg4: memref<1x128xf32, #tpu.memory_space<vmem>>, %arg5: memref<128x256xbf16, #tpu.memory_space<vmem>>, %arg6: memref<1x256xf32, #tpu.memory_space<vmem>>, %arg7: memref<128x128xbf16, #tpu.memory_space<vmem>>, %arg8: memref<1x128xf32, #tpu.memory_space<vmem>>, %arg9: memref<128x128xbf16, #tpu.memory_space<vmem>>, %arg10: memref<1x128xf32, #tpu.memory_space<vmem>>, %arg11: memref<128x128xf32, #tpu.memory_space<vmem>>, %arg12: memref<128x128xf32, #tpu.memory_space<vmem>>, %arg13: memref<128x128xf32, #tpu.memory_space<vmem>>) attributes {dimension_semantics = [#tpu.dimension_semantics<parallel>], iteration_bounds = array<i64: 2>, scalar_prefetch = 0 : i64, scratch_operands = 0 : i64, tpu.core_type = #tpu.core_type<tc>, window_params = [{transform_indices = @transform_0, window_bounds = array<i64: 128, 128>}, {transform_indices = @transform_1, window_bounds = array<i64: 128, 128>}, {pipeline_mode = #tpu.pipeline_mode<synchronous>, transform_indices = @transform_2, window_bounds = array<i64: 128, 128>}, {pipeline_mode = #tpu.pipeline_mode<synchronous>, transform_indices = @transform_3, window_bounds = array<i64: 1, 128>}, {pipeline_mode = #tpu.pipeline_mode<synchronous>, transform_indices = @transform_4, window_bounds = array<i64: 128, 256>}, {pipeline_mode = #tpu.pipeline_mode<synchronous>, transform_indices = @transform_5, window_bounds = array<i64: 1, 256>}, {pipeline_mode = #tpu.pipeline_mode<synchronous>, transform_indices = @transform_6, window_bounds = array<i64: 128, 128>}, {pipeline_mode = #tpu.pipeline_mode<synchronous>, transform_indices = @transform_7, window_bounds = array<i64: 1, 128>}, {pipeline_mode = #tpu.pipeline_mode<synchronous>, transform_indices = @transform_8, window_bounds = array<i64: 128, 128>}, {pipeline_mode = #tpu.pipeline_mode<synchronous>, transform_indices = @transform_9, window_bounds = array<i64: 1, 128>}, {transform_indices = @transform_10, window_bounds = array<i64: 128, 128>}, {transform_indices = @transform_11, window_bounds = array<i64: 128, 128>}, {transform_indices = @transform_12, window_bounds = array<i64: 128, 128>}]} {
    %c0 = arith.constant 0 : index
    %c0_0 = arith.constant 0 : index
    %0 = vector.load %arg1[%c0, %c0_0] : memref<128x128xbf16, #tpu.memory_space<vmem>>, vector<128x128xbf16>
    %c0_1 = arith.constant 0 : index
    %c0_2 = arith.constant 0 : index
    %1 = vector.load %arg3[%c0_1, %c0_2] : memref<128x128xbf16, #tpu.memory_space<vmem>>, vector<128x128xbf16>
    %cst = arith.constant dense<0.000000e+00> : vector<128x128xf32>
    %2 = tpu.matmul %0, %1, %cst {dimension_numbers = #tpu.dot_dimension_numbers<[1], [0], [0], [1], [0, 0, 1, 1], [], []>} : vector<128x128xbf16>, vector<128x128xbf16>, vector<128x128xf32> -> vector<128x128xf32>
    %c0_3 = arith.constant 0 : index
    %c0_4 = arith.constant 0 : index
    %3 = vector.load %arg4[%c0_3, %c0_4] : memref<1x128xf32, #tpu.memory_space<vmem>>, vector<1x128xf32>
    %4 = vector.broadcast %3 : vector<1x128xf32> to vector<128x128xf32>
    %5 = arith.addf %2, %4 : vector<128x128xf32>
    %cst_5 = arith.constant 0.000000e+00 : f32
    %6 = vector.broadcast %cst_5 : f32 to vector<128x128xf32>
    %7 = arith.maximumf %5, %6 : vector<128x128xf32>
    %8 = arith.truncf %7 : vector<128x128xf32> to vector<128x128xbf16>
    %c0_6 = arith.constant 0 : index
    %c0_7 = arith.constant 0 : index
    %9 = vector.load %arg5[%c0_6, %c0_7] : memref<128x256xbf16, #tpu.memory_space<vmem>>, vector<128x256xbf16>
    %cst_8 = arith.constant dense<0.000000e+00> : vector<128x256xf32>
    %10 = tpu.matmul %8, %9, %cst_8 {dimension_numbers = #tpu.dot_dimension_numbers<[1], [0], [0], [1], [0, 0, 1, 1], [], []>} : vector<128x128xbf16>, vector<128x256xbf16>, vector<128x256xf32> -> vector<128x256xf32>
    %c0_9 = arith.constant 0 : index
    %c0_10 = arith.constant 0 : index
    %11 = vector.load %arg6[%c0_9, %c0_10] : memref<1x256xf32, #tpu.memory_space<vmem>>, vector<1x256xf32>
    %12 = vector.broadcast %11 : vector<1x256xf32> to vector<128x256xf32>
    %13 = arith.addf %10, %12 : vector<128x256xf32>
    %14 = vector.extract_strided_slice %13 {offsets = [0, 0], sizes = [128, 128], strides = [1, 1]} : vector<128x256xf32> to vector<128x128xf32>
    %15 = vector.extract_strided_slice %13 {offsets = [0, 128], sizes = [128, 128], strides = [1, 1]} : vector<128x256xf32> to vector<128x128xf32>
    %cst_11 = arith.constant 5.000000e-01 : f32
    %16 = vector.broadcast %cst_11 : f32 to vector<128x128xf32>
    %17 = arith.mulf %16, %15 : vector<128x128xf32>
    %18 = math.exp %17 : vector<128x128xf32>
    %c0_12 = arith.constant 0 : index
    %c0_13 = arith.constant 0 : index
    %19 = vector.load %arg2[%c0_12, %c0_13] : memref<128x128xf32, #tpu.memory_space<vmem>>, vector<128x128xf32>
    %20 = arith.mulf %19, %18 : vector<128x128xf32>
    %21 = arith.addf %14, %20 : vector<128x128xf32>
    %22 = arith.truncf %21 : vector<128x128xf32> to vector<128x128xbf16>
    %c0_14 = arith.constant 0 : index
    %c0_15 = arith.constant 0 : index
    %23 = vector.load %arg7[%c0_14, %c0_15] : memref<128x128xbf16, #tpu.memory_space<vmem>>, vector<128x128xbf16>
    %cst_16 = arith.constant dense<0.000000e+00> : vector<128x128xf32>
    %24 = tpu.matmul %22, %23, %cst_16 {dimension_numbers = #tpu.dot_dimension_numbers<[1], [0], [0], [1], [0, 0, 1, 1], [], []>} : vector<128x128xbf16>, vector<128x128xbf16>, vector<128x128xf32> -> vector<128x128xf32>
    %c0_17 = arith.constant 0 : index
    %c0_18 = arith.constant 0 : index
    %25 = vector.load %arg8[%c0_17, %c0_18] : memref<1x128xf32, #tpu.memory_space<vmem>>, vector<1x128xf32>
    %26 = vector.broadcast %25 : vector<1x128xf32> to vector<128x128xf32>
    %27 = arith.addf %24, %26 : vector<128x128xf32>
    %cst_19 = arith.constant 0.000000e+00 : f32
    %28 = vector.broadcast %cst_19 : f32 to vector<128x128xf32>
    %29 = arith.maximumf %27, %28 : vector<128x128xf32>
    %30 = arith.truncf %29 : vector<128x128xf32> to vector<128x128xbf16>
    %c0_20 = arith.constant 0 : index
    %c0_21 = arith.constant 0 : index
    %31 = vector.load %arg9[%c0_20, %c0_21] : memref<128x128xbf16, #tpu.memory_space<vmem>>, vector<128x128xbf16>
    %cst_22 = arith.constant dense<0.000000e+00> : vector<128x128xf32>
    %32 = tpu.matmul %30, %31, %cst_22 {dimension_numbers = #tpu.dot_dimension_numbers<[1], [0], [0], [1], [0, 0, 1, 1], [], []>} : vector<128x128xbf16>, vector<128x128xbf16>, vector<128x128xf32> -> vector<128x128xf32>
    %c0_23 = arith.constant 0 : index
    %c0_24 = arith.constant 0 : index
    %33 = vector.load %arg10[%c0_23, %c0_24] : memref<1x128xf32, #tpu.memory_space<vmem>>, vector<1x128xf32>
    %34 = vector.broadcast %33 : vector<1x128xf32> to vector<128x128xf32>
    %35 = arith.addf %32, %34 : vector<128x128xf32>
    %cst_25 = arith.constant 0.000000e+00 : f32
    %36 = vector.broadcast %cst_25 : f32 to vector<128x128xf32>
    %37 = arith.subf %36, %35 : vector<128x128xf32>
    %38 = math.exp %37 : vector<128x128xf32>
    %cst_26 = arith.constant 1.000000e+00 : f32
    %39 = vector.broadcast %cst_26 : f32 to vector<128x128xf32>
    %40 = arith.addf %39, %38 : vector<128x128xf32>
    %41 = tpu.reciprocal %40 {approx = true} : vector<128x128xf32> -> vector<128x128xf32>
    %c0_27 = arith.constant 0 : index
    %c0_28 = arith.constant 0 : index
    %42 = vector.load %arg11[%c0_27, %c0_28] : memref<128x128xf32, #tpu.memory_space<vmem>>, vector<128x128xf32>
    tpu.vector_store %arg11[%c0_27, %c0_28], %41 {strides = array<i32>} : memref<128x128xf32, #tpu.memory_space<vmem>>, vector<128x128xf32>,
    %c0_29 = arith.constant 0 : index
    %c0_30 = arith.constant 0 : index
    %43 = vector.load %arg12[%c0_29, %c0_30] : memref<128x128xf32, #tpu.memory_space<vmem>>, vector<128x128xf32>
    tpu.vector_store %arg12[%c0_29, %c0_30], %14 {strides = array<i32>} : memref<128x128xf32, #tpu.memory_space<vmem>>, vector<128x128xf32>,
    %c0_31 = arith.constant 0 : index
    %c0_32 = arith.constant 0 : index
    %44 = vector.load %arg13[%c0_31, %c0_32] : memref<128x128xf32, #tpu.memory_space<vmem>>, vector<128x128xf32>
    tpu.vector_store %arg13[%c0_31, %c0_32], %15 {strides = array<i32>} : memref<128x128xf32, #tpu.memory_space<vmem>>, vector<128x128xf32>,
    return
  }
  func.func @transform_0(%arg0: i32) -> (i32, i32) {
    %c0_i32 = arith.constant 0 : i32
    %c0_i32_0 = arith.constant 0 : i32
    return %arg0, %c0_i32 : i32, i32
  }
  func.func @transform_1(%arg0: i32) -> (i32, i32) {
    %c0_i32 = arith.constant 0 : i32
    %c0_i32_0 = arith.constant 0 : i32
    return %arg0, %c0_i32 : i32, i32
  }
  func.func @transform_2(%arg0: i32) -> (i32, i32) {
    %c0_i32 = arith.constant 0 : i32
    %c0_i32_0 = arith.constant 0 : i32
    %c0_i32_1 = arith.constant 0 : i32
    return %c0_i32, %c0_i32_0 : i32, i32
  }
  func.func @transform_3(%arg0: i32) -> (i32, i32) {
    %c0_i32 = arith.constant 0 : i32
    %c0_i32_0 = arith.constant 0 : i32
    %c0_i32_1 = arith.constant 0 : i32
    return %c0_i32, %c0_i32_0 : i32, i32
  }
  func.func @transform_4(%arg0: i32) -> (i32, i32) {
    %c0_i32 = arith.constant 0 : i32
    %c0_i32_0 = arith.constant 0 : i32
    %c0_i32_1 = arith.constant 0 : i32
    return %c0_i32, %c0_i32_0 : i32, i32
  }
  func.func @transform_5(%arg0: i32) -> (i32, i32) {
    %c0_i32 = arith.constant 0 : i32
    %c0_i32_0 = arith.constant 0 : i32
    %c0_i32_1 = arith.constant 0 : i32
    return %c0_i32, %c0_i32_0 : i32, i32
  }
  func.func @transform_6(%arg0: i32) -> (i32, i32) {
    %c0_i32 = arith.constant 0 : i32
    %c0_i32_0 = arith.constant 0 : i32
    %c0_i32_1 = arith.constant 0 : i32
    return %c0_i32, %c0_i32_0 : i32, i32
  }
  func.func @transform_7(%arg0: i32) -> (i32, i32) {
    %c0_i32 = arith.constant 0 : i32
    %c0_i32_0 = arith.constant 0 : i32
    %c0_i32_1 = arith.constant 0 : i32
    return %c0_i32, %c0_i32_0 : i32, i32
  }
  func.func @transform_8(%arg0: i32) -> (i32, i32) {
    %c0_i32 = arith.constant 0 : i32
    %c0_i32_0 = arith.constant 0 : i32
    %c0_i32_1 = arith.constant 0 : i32
    return %c0_i32, %c0_i32_0 : i32, i32
  }
  func.func @transform_9(%arg0: i32) -> (i32, i32) {
    %c0_i32 = arith.constant 0 : i32
    %c0_i32_0 = arith.constant 0 : i32
    %c0_i32_1 = arith.constant 0 : i32
    return %c0_i32, %c0_i32_0 : i32, i32
  }
  func.func @transform_10(%arg0: i32) -> (i32, i32) {
    %c0_i32 = arith.constant 0 : i32
    %c0_i32_0 = arith.constant 0 : i32
    return %arg0, %c0_i32 : i32, i32
  }
  func.func @transform_11(%arg0: i32) -> (i32, i32) {
    %c0_i32 = arith.constant 0 : i32
    %c0_i32_0 = arith.constant 0 : i32
    return %arg0, %c0_i32 : i32, i32
  }
  func.func @transform_12(%arg0: i32) -> (i32, i32) {
    %c0_i32 = arith.constant 0 : i32
    %c0_i32_0 = arith.constant 0 : i32
    return %arg0, %c0_i32 : i32, i32
  }
}

</mosaic_0001>

<bundles_post_ra>
// kernel: vae_forward.1
= control target key start
LH: loop header
LB: loop body
LE: loop exit
PB: predicated region body
PF: predicated region fallthrough
CT: control target
= control target key end

     0   :  { %s1958_s21 = smov 0   ;;  %s2328_s0 = inlined_call_operand.vmem [shape: bf16[256,128], index: 0, kind: input, shape index: {}]   ;;  %s2329_s1 = inlined_call_operand.vmem [shape: f32[256,128], index: 1, kind: input, shape index: {}]   ;;  %s2330_s2 = inlined_call_operand.vmem [shape: bf16[128,128], index: 2, kind: input, shape index: {}]   ;;  %s2331_s3 = inlined_call_operand.vmem [shape: f32[1,128], index: 3, kind: input, shape index: {}]   ;;  %s2332_s4 = inlined_call_operand.vmem [shape: bf16[128,256], index: 4, kind: input, shape index: {}]   ;;  %s2333_s5 = inlined_call_operand.vmem [shape: f32[1,256], index: 5, kind: input, shape index: {}]   ;;  %s2334_s6 = inlined_call_operand.vmem [shape: bf16[128,128], index: 6, kind: input, shape index: {}]   ;;  %s2335_s7 = inlined_call_operand.vmem [shape: f32[1,128], index: 7, kind: input, shape index: {}]   ;;  %s2336_s8 = inlined_call_operand.vmem [shape: bf16[128,128], index: 8, kind: input, shape index: {}]   ;;  %s2337_s9 = inlined_call_operand.vmem [shape: f32[1,128], index: 9, kind: input, shape index: {}]   ;;  %s2338_s10 = inlined_call_operand.vmem [shape: f32[256,128], index: 10, kind: output, shape index: {0}]   ;;  %s2339_s11 = inlined_call_operand.vmem [shape: f32[256,128], index: 11, kind: output, shape index: {1}]   ;;  %s2340_s12 = inlined_call_operand.vmem [shape: f32[256,128], index: 12, kind: output, shape index: {2}]  }
   0x1 LB: > { %s1497_s22 = sadd.s32 4294967295, %s1891_s21   ;;  %p1501_p0 = scmp.ge.s32.totalorder %s1891_s21, 1  ;;  %s1891_s21 = sphi %s1958_s21, %s23_s21  }
   0x2   : > { %p379_p1 = scmp.lt.s32.totalorder %s1891_s21, 3 }
   0x4   : > { %p380_p2 = pnand %p1501_p0, %p379_p1 }
   0x5   : > { %s1502_s13 = sshll.u32 (!%p380_p2), %s1497_s22, 4 }
   0x6   : > { %383 = sbr.rel (%p380_p2) target bundleno = 757 (0x2f5), region = 60  ;;  %p437_p3 = scmp.lt.s32.totalorder (!%p380_p2), %s1502_s13, 31 }
   0xb   : > { %v1721_v0 = vld [vmem:[%s2330_s2 + $0x38] sm:$0xff]  ;;  %v1720_v1 = vld [vmem:[%s2330_s2 + $0x30] sm:$0xff]  ;;  %v1719_v2 = vld [vmem:[%s2330_s2 + $0x28] sm:$0xff]  ;;  %s2342_s13 = smov (!%p437_p3, %s1502_s13), 31 }
   0xc   : > { %598 = vmatpush.bf16.msra.mxu0 %v1721_v0  ;;  %1754 = vmatpush.bf16.msra.mxu1 %v1721_v0  ;;  %v1718_v3 = vld [vmem:[%s2330_s2 + $0x20] sm:$0xff]  ;;  %v1717_v4 = vld [vmem:[%s2330_s2 + $0x18] sm:$0xff]  ;;  %v1716_v5 = vld [vmem:[%s2330_s2 + $0x10] sm:$0xff]  ;;  %s1503_s20 = sshll.u32 %s2342_s13, 2  ;;  %s2148_s14 = sshll.u32 %s2342_s13, 3 }
   0xd   : > { %1755 = vmatpush.bf16.msra.mxu2 %v1721_v0  ;;  %1756 = vmatpush.bf16.msra.mxu3 %v1721_v0  ;;  %v1715_v6 = vld [vmem:[%s2330_s2 + $0x8] sm:$0xff]  ;;  %v1736_v7 = vld [vmem:[%s2332_s4 + $0x74] sm:$0xf]  ;;  %s1996_s26 = scalar_lea.vmem %s2328_s0, %s1503_s20  ;;  %v1636_v8 = vld [vmem:[%s2332_s4 + $0x78] sm:$0xf0]  ;;  %s2159_s19 = scalar_lea.vmem %s2339_s11, %s2148_s14 }
   0xe   : > { %v1634_v9 = vld [vmem:[%s2332_s4 + $0x70] sm:$0xf]  ;;  %v1737_v10 = vld [vmem:[%s2332_s4 + $0x74] sm:$0xf0]  ;;  %v1714_v11 = vld [vmem:[%s2330_s2] sm:$0xff]  ;;  %v1639_v14 = vor.u32 %v1736_v7, %v1636_v8  ;;  %s2169_s22 = scalar_lea.vmem %s2340_s12, %s2148_s14  ;;  %s2183_s24 = scalar_lea.vmem %s2329_s1, %s2148_s14 }
   0xf   : > { %v1706_v12 = vld [vmem:[%s1996_s26] sm:$0xff]  ;;  %v1708_v13 = vld [vmem:[%s1996_s26 + $0x10] sm:$0xff]  ;;  %v1635_v15 = vor.u32 %v1737_v10, %v1634_v9  ;;  %v1628_v17 = vld [vmem:[%s2332_s4 + $0x68] sm:$0xf0]  ;;  %s2294_s16 = scalar_lea.vmem %s2338_s10, %s2148_s14 }
  0x10   : > { %599 = vmatpush.bf16.msra.mxu0 %v1720_v1  ;;  %1757 = vmatpush.bf16.msra.mxu1 %v1720_v1  ;;  %v1734_v16 = vld [vmem:[%s2332_s4 + $0x64] sm:$0xf]  ;;  %v1626_v18 = vld [vmem:[%s2332_s4 + $0x60] sm:$0xf]  ;;  %v1735_v19 = vld [vmem:[%s2332_s4 + $0x64] sm:$0xf0] }
  0x11   : > { %1758 = vmatpush.bf16.msra.mxu2 %v1720_v1  ;;  %1759 = vmatpush.bf16.msra.mxu3 %v1720_v1  ;;  %v1710_v20 = vld [vmem:[%s1996_s26 + $0x20] sm:$0xff]  ;;  %v1712_v21 = vld [vmem:[%s1996_s26 + $0x30] sm:$0xff]  ;;  %v1631_v22 = vor.u32 %v1734_v16, %v1628_v17  ;;  %v1627_v23 = vor.u32 %v1735_v19, %v1626_v18  ;;  %v1620_v25 = vld [vmem:[%s2332_s4 + $0x58] sm:$0xf0] }
  0x12   : > { %v1732_v24 = vld [vmem:[%s2332_s4 + $0x54] sm:$0xf]  ;;  %v1618_v26 = vld [vmem:[%s2332_s4 + $0x50] sm:$0xf]  ;;  %v1733_v27 = vld [vmem:[%s2332_s4 + $0x54] sm:$0xf0] }
  0x13   : > { %v1623_v28 = vor.u32 %v1732_v24, %v1620_v25  ;;  %v1619_v29 = vor.u32 %v1733_v27, %v1618_v26  ;;  %v1730_v30 = vld [vmem:[%s2332_s4 + $0x44] sm:$0xf]  ;;  %v1612_v31 = vld [vmem:[%s2332_s4 + $0x48] sm:$0xf0]  ;;  %v1610_v32 = vld [vmem:[%s2332_s4 + $0x40] sm:$0xf] }
  0x14   : > { %600 = vmatpush.bf16.msra.mxu0 %v1719_v2  ;;  %1760 = vmatpush.bf16.msra.mxu1 %v1719_v2  ;;  %v1731_v33 = vld [vmem:[%s2332_s4 + $0x44] sm:$0xf0]  ;;  %v1615_v34 = vor.u32 %v1730_v30, %v1612_v31  ;;  %v1728_v36 = vld [vmem:[%s2332_s4 + $0x34] sm:$0xf]  ;;  %v1604_v37 = vld [vmem:[%s2332_s4 + $0x38] sm:$0xf0] }
  0x15   : > { %1761 = vmatpush.bf16.msra.mxu2 %v1719_v2  ;;  %1762 = vmatpush.bf16.msra.mxu3 %v1719_v2  ;;  %v1611_v35 = vor.u32 %v1731_v33, %v1610_v32  ;;  %v1607_v38 = vor.u32 %v1728_v36, %v1604_v37  ;;  %v1707_v39 = vld [vmem:[%s1996_s26 + $0x8] sm:$0xff]  ;;  %v1709_v40 = vld [vmem:[%s1996_s26 + $0x18] sm:$0xff]  ;;  %v1602_v43 = vld [vmem:[%s2332_s4 + $0x30] sm:$0xf] }
  0x16   : > { %v1711_v41 = vld [vmem:[%s1996_s26 + $0x28] sm:$0xff]  ;;  %v1713_v42 = vld [vmem:[%s1996_s26 + $0x38] sm:$0xff]  ;;  %v1726_v46 = vld [vmem:[%s2332_s4 + $0x24] sm:$0xf] }
  0x17   : > { %v1729_v44 = vld [vmem:[%s2332_s4 + $0x34] sm:$0xf0]  ;;  %v1596_v47 = vld [vmem:[%s2332_s4 + $0x28] sm:$0xf0]  ;;  %v1594_v48 = vld [vmem:[%s2332_s4 + $0x20] sm:$0xf] }
  0x18   : > { %601 = vmatpush.bf16.msra.mxu0 %v1718_v3  ;;  %1763 = vmatpush.bf16.msra.mxu1 %v1718_v3  ;;  %v1603_v45 = vor.u32 %v1729_v44, %v1602_v43  ;;  %v1599_v49 = vor.u32 %v1726_v46, %v1596_v47  ;;  %v1727_v50 = vld [vmem:[%s2332_s4 + $0x24] sm:$0xf0]  ;;  %v1724_v52 = vld [vmem:[%s2332_s4 + $0x14] sm:$0xf]  ;;  %v1588_v53 = vld [vmem:[%s2332_s4 + $0x18] sm:$0xf0] }
  0x19   : > { %1764 = vmatpush.bf16.msra.mxu2 %v1718_v3  ;;  %1765 = vmatpush.bf16.msra.mxu3 %v1718_v3  ;;  %v1595_v51 = vor.u32 %v1727_v50, %v1594_v48  ;;  %v1591_v54 = vor.u32 %v1724_v52, %v1588_v53  ;;  %v1586_v55 = vld [vmem:[%s2332_s4 + $0x10] sm:$0xf]  ;;  %v1725_v56 = vld [vmem:[%s2332_s4 + $0x14] sm:$0xf0]  ;;  %v1722_v58 = vld [vmem:[%s2332_s4 + $0x4] sm:$0xf] }
  0x1a   : > { %v1587_v57 = vor.u32 %v1725_v56, %v1586_v55  ;;  %v1580_v59 = vld [vmem:[%s2332_s4 + $0x8] sm:$0xf0]  ;;  %v1578_v60 = vld [vmem:[%s2332_s4] sm:$0xf]  ;;  %v1723_v62 = vld [vmem:[%s2332_s4 + $0x4] sm:$0xf0] }
  0x1b   : > { %v1583_v61 = vor.u32 %v1722_v58, %v1580_v59  ;;  %v1579_v63 = vor.u32 %v1723_v62, %v1578_v60  ;;  %v2105_v1 = vld [vmem:[%s2331_s3] ss:$0 sm:$0xff]  ;;  %v1744_v52 = vld [vmem:[%s2334_s6 + $0x30] sm:$0xff]  ;;  %v1743_v56 = vld [vmem:[%s2334_s6 + $0x28] sm:$0xff] }
  0x1c   : > { %602 = vmatpush.bf16.msra.mxu0 %v1717_v4  ;;  %1766 = vmatpush.bf16.msra.mxu1 %v1717_v4  ;;  %v1742_v59 = vld [vmem:[%s2334_s6 + $0x20] sm:$0xff]  ;;  %v1740_v62 = vld [vmem:[%s2334_s6 + $0x10] sm:$0xff] }
  0x1d   : > { %1767 = vmatpush.bf16.msra.mxu2 %v1717_v4  ;;  %1768 = vmatpush.bf16.msra.mxu3 %v1717_v4 }
  0x20   : > { %603 = vmatpush.bf16.msra.mxu0 %v1716_v5  ;;  %1769 = vmatpush.bf16.msra.mxu1 %v1716_v5 }
  0x21   : > { %1770 = vmatpush.bf16.msra.mxu2 %v1716_v5  ;;  %1771 = vmatpush.bf16.msra.mxu3 %v1716_v5 }
  0x24   : > { %604 = vmatpush.bf16.msra.mxu0 %v1715_v6  ;;  %1772 = vmatpush.bf16.msra.mxu1 %v1715_v6 }
  0x25   : > { %1773 = vmatpush.bf16.msra.mxu2 %v1715_v6  ;;  %1774 = vmatpush.bf16.msra.mxu3 %v1715_v6 }
  0x28   : > { %605 = vmatpush.bf16.msra.mxu0 %v1714_v11  ;;  %1775 = vmatpush.bf16.msra.mxu1 %v1714_v11 }
  0x29   : > { %1776 = vmatpush.bf16.msra.mxu2 %v1714_v11  ;;  %1777 = vmatpush.bf16.msra.mxu3 %v1714_v11 }
  0x2b   : > { %606 = vmatmul.bf16.vlgmr.msra.gmra.mxu0 %v1706_v12  ;;  %616 = vmatmul.bf16.vlgmr.msra.gmra.mxu1 %v1708_v13 }
  0x2c   : > { %773 = vmatpush.bf16.msrb.mxu1 %v1635_v15  ;;  %626 = vmatmul.bf16.vlgmr.msra.gmra.mxu2 %v1710_v20 }
  0x2d   : > { %822 = vmatpush.bf16.msrb.mxu2 %v1639_v14  ;;  %636 = vmatmul.bf16.vlgmr.msra.gmra.mxu3 %v1712_v21 }
  0x30   : > { %774 = vmatpush.bf16.msrb.mxu1 %v1627_v23 }
  0x31   : > { %823 = vmatpush.bf16.msrb.mxu2 %v1631_v22 }
  0x34   : > { %775 = vmatpush.bf16.msrb.mxu1 %v1619_v29 }
  0x35   : > { %824 = vmatpush.bf16.msrb.mxu2 %v1623_v28 }
  0x38   : > { %776 = vmatpush.bf16.msrb.mxu1 %v1611_v35 }
  0x39   : > { %825 = vmatpush.bf16.msrb.mxu2 %v1615_v34 }
  0x3b   : > { %611 = vmatmul.bf16.gmra.mxu0 %v1707_v39  ;;  %621 = vmatmul.bf16.gmra.mxu1 %v1709_v40 }
  0x3c   : > { %631 = vmatmul.bf16.gmra.mxu2 %v1711_v41  ;;  %777 = vmatpush.bf16.msrb.mxu1 %v1603_v45 }
  0x3d   : > { %826 = vmatpush.bf16.msrb.mxu2 %v1607_v38  ;;  %641 = vmatmul.bf16.gmra.mxu3 %v1713_v42 }
  0x40   : > { %778 = vmatpush.bf16.msrb.mxu1 %v1595_v51  ;;  %v1745_v51 = vld [vmem:[%s2334_s6 + $0x38] sm:$0xff] }
  0x41   : > { %827 = vmatpush.bf16.msrb.mxu2 %v1599_v49  ;;  %1043 = vmatpush.bf16.msrb.mxu3 %v1745_v51 }
  0x44   : > { %779 = vmatpush.bf16.msrb.mxu1 %v1587_v57 }
  0x45   : > { %828 = vmatpush.bf16.msrb.mxu2 %v1591_v54  ;;  %1044 = vmatpush.bf16.msrb.mxu3 %v1744_v52 }
  0x48   : > { %780 = vmatpush.bf16.msrb.mxu1 %v1579_v63  ;;  %v1739_v63 = vld [vmem:[%s2334_s6 + $0x8] sm:$0xff] }
  0x49   : > { %829 = vmatpush.bf16.msrb.mxu2 %v1583_v61  ;;  %1045 = vmatpush.bf16.msrb.mxu3 %v1743_v56  ;;  %v1741_v61 = vld [vmem:[%s2334_s6 + $0x18] sm:$0xff] }
  0x4d   : > { %1046 = vmatpush.bf16.msrb.mxu3 %v1742_v59 }
  0x51   : > { %1047 = vmatpush.bf16.msrb.mxu3 %v1741_v61 }
  0x55   : > { %1048 = vmatpush.bf16.msrb.mxu3 %v1740_v62 }
  0x59   : > { %1049 = vmatpush.bf16.msrb.mxu3 %v1739_v63  ;;  %v923_v63 = vld [vmem:[%s2183_s24 + $0x20] sm:$0xff] }
  0xa8   : > { %v607_v0 = vpop.f32.mrf.mxu0  ;;  %v617_v9 = vpop.f32.mrf.mxu1 }
  0xa9   : > { %v608_v2 = vadd.f32 %v2105_v1, %v607_v0  ;;  %v618_v17 = vadd.f32 %v2105_v1, %v617_v9  ;;  %v687_v0 = vld [vmem:[%s2333_s5] sm:$0x3] }
  0xab   : > { %v647_v5 = vmax.f32 %v608_v2, 0.0  ;;  %v651_v20 = vmax.f32 %v618_v17, 0.0  ;;  %v1738_v2 = vld [vmem:[%s2334_s6] sm:$0xff] }
  0xac   : > { %1050 = vmatpush.bf16.msrb.mxu3 %v1738_v2 }
  0xaf   : > { %v627_v24 = vpop.f32.mrf.mxu2 }
  0xb0   : > { %v609_v3 = vpop.f32.mrf.mxu0  ;;  %v619_v16 = vpop.f32.mrf.mxu1  ;;  %v628_v31 = vadd.f32 %v2105_v1, %v627_v24 }
  0xb1   : > { %v610_v4 = vadd.f32 %v2105_v1, %v609_v3  ;;  %v620_v18 = vadd.f32 %v2105_v1, %v619_v16  ;;  %v637_v38 = vpop.f32.mrf.mxu3 }
  0xb2   : > { %v655_v34 = vmax.f32 %v628_v31, 0.0  ;;  %v638_v45 = vadd.f32 %v2105_v1, %v637_v38 }
  0xb3   : > { %v648_v6 = vmax.f32 %v610_v4, 0.0  ;;  %v652_v21 = vmax.f32 %v620_v18, 0.0 }
  0xb4   : > { %v659_v48 = vmax.f32 %v638_v45, 0.0 }
  0xb5   : > { %v663_v7 = vpack.c.bf16 %v648_v6, %v647_v5  ;;  %v665_v22 = vpack.c.bf16 %v652_v21, %v651_v20  ;;  %v2163_v5 = vperm.slane %v687_v0, 1  ;;  %v919_v21 = vld [vmem:[%s2183_s24] sm:$0xff] }
  0xb7   : > { %781 = vmatmul.bf16.vlgmr.msrb.gmra.mxu1 %v663_v7  ;;  %830 = vmatmul.bf16.vlgmr.msrb.gmra.mxu2 %v663_v7  ;;  %v629_v30 = vpop.f32.mrf.mxu2 }
  0xb8   : > { %v612_v8 = vpop.f32.mrf.mxu0  ;;  %v622_v19 = vpop.f32.mrf.mxu1  ;;  %v630_v32 = vadd.f32 %v2105_v1, %v629_v30 }
  0xb9   : > { %v613_v10 = vadd.f32 %v2105_v1, %v612_v8  ;;  %v623_v25 = vadd.f32 %v2105_v1, %v622_v19  ;;  %v639_v44 = vpop.f32.mrf.mxu3 }
  0xba   : > { %v656_v35 = vmax.f32 %v630_v32, 0.0  ;;  %v640_v46 = vadd.f32 %v2105_v1, %v639_v44 }
  0xbb   : > { %v649_v13 = vmax.f32 %v613_v10, 0.0  ;;  %v653_v27 = vmax.f32 %v623_v25, 0.0  ;;  %v920_v25 = vld [vmem:[%s2183_s24 + $0x8] sm:$0xff] }
  0xbc   : > { %v667_v36 = vpack.c.bf16 %v656_v35, %v655_v34  ;;  %v660_v49 = vmax.f32 %v640_v46, 0.0  ;;  %v922_v46 = vld [vmem:[%s2183_s24 + $0x18] sm:$0xff] }
  0xbe   : > { %v669_v50 = vpack.c.bf16 %v660_v49, %v659_v48 }
  0xbf   : > { %v632_v33 = vpop.f32.mrf.mxu2 }
  0xc0   : > { %v614_v11 = vpop.f32.mrf.mxu0  ;;  %v624_v23 = vpop.f32.mrf.mxu1  ;;  %v633_v39 = vadd.f32 %v2105_v1, %v632_v33 }
  0xc1   : > { %v615_v12 = vadd.f32 %v2105_v1, %v614_v11  ;;  %v625_v26 = vadd.f32 %v2105_v1, %v624_v23  ;;  %v642_v47 = vpop.f32.mrf.mxu3 }
  0xc2   : > { %v657_v41 = vmax.f32 %v633_v39, 0.0  ;;  %v643_v54 = vadd.f32 %v2105_v1, %v642_v47 }
  0xc3   : > { %v650_v14 = vmax.f32 %v615_v12, 0.0  ;;  %v654_v28 = vmax.f32 %v625_v26, 0.0 }
  0xc4   : > { %v661_v57 = vmax.f32 %v643_v54, 0.0 }
  0xc5   : > { %v664_v15 = vpack.c.bf16 %v650_v14, %v649_v13  ;;  %v666_v29 = vpack.c.bf16 %v654_v28, %v653_v27 }
  0xc7   : > { %786 = vmatmul.bf16.gmra.mxu1 %v664_v15  ;;  %835 = vmatmul.bf16.gmra.mxu2 %v664_v15  ;;  %v634_v37 = vpop.f32.mrf.mxu2 }
  0xc8   : > { %v635_v40 = vadd.f32 %v2105_v1, %v634_v37 }
  0xc9   : > { %v644_v53 = vpop.f32.mrf.mxu3 }
  0xca   : > { %v658_v42 = vmax.f32 %v635_v40, 0.0  ;;  %v645_v55 = vadd.f32 %v2105_v1, %v644_v53  ;;  %v2150_v1 = vperm.slane %v687_v0, 0 }
  0xcc   : > { %v668_v43 = vpack.c.bf16 %v658_v42, %v657_v41  ;;  %v662_v58 = vmax.f32 %v645_v55, 0.0  ;;  %v921_v42 = vld [vmem:[%s2183_s24 + $0x10] sm:$0xff] }
  0xce   : > { %v670_v60 = vpack.c.bf16 %v662_v58, %v661_v57 }
  0xd7   : > { %791 = vmatmul.bf16.gmra.mxu1 %v665_v22  ;;  %840 = vmatmul.bf16.gmra.mxu2 %v665_v22 }
  0xe7   : > { %796 = vmatmul.bf16.gmra.mxu1 %v666_v29  ;;  %845 = vmatmul.bf16.gmra.mxu2 %v666_v29 }
  0xf7   : > { %801 = vmatmul.bf16.gmra.mxu1 %v667_v36  ;;  %850 = vmatmul.bf16.gmra.mxu2 %v667_v36 }
 0x107   : > { %806 = vmatmul.bf16.gmra.mxu1 %v668_v43  ;;  %855 = vmatmul.bf16.gmra.mxu2 %v668_v43 }
 0x117   : > { %811 = vmatmul.bf16.gmra.mxu1 %v669_v50  ;;  %860 = vmatmul.bf16.gmra.mxu2 %v669_v50 }
 0x127   : > { %816 = vmatmul.bf16.gmra.mxu1 %v670_v60  ;;  %865 = vmatmul.bf16.gmra.mxu2 %v670_v60 }
 0x134   : > { %v782_v3 = vpop.f32.mrf.mxu1 }
 0x135   : > { %v783_v4 = vadd.f32 %v782_v3, %v2150_v1 }
 0x137   : > { %1329 = vst [vmem:[%s2159_s19] sm:$0xff] %v783_v4 }
 0x13a   : > { %v831_v6 = vpop.f32.mrf.mxu2 }
 0x13b   : > { %v832_v7 = vadd.f32 %v831_v6, %v2163_v5 }
 0x13c   : > { %v784_v8 = vpop.f32.mrf.mxu1 }
 0x13d   : > { %v871_v9 = vmul.f32 0.5, %v832_v7  ;;  %1345 = vst [vmem:[%s2169_s22] sm:$0xff] %v832_v7  ;;  %v785_v10 = vadd.f32 %v784_v8, %v2150_v1 }
 0x13f   : > { %1330 = vst [vmem:[%s2159_s19 + $0x8] sm:$0xff] %v785_v10  ;;  %v887_v11 = vmul.f32 1.442695, %v871_v9 }
 0x141   : > { %1789 = vpow2.f32 %v887_v11 }
 0x142   : > { %v833_v12 = vpop.f32.mrf.mxu2 }
 0x143   : > { %v834_v13 = vadd.f32 %v833_v12, %v2163_v5 }
 0x144   : > { %v787_v14 = vpop.f32.mrf.mxu1 }
 0x145   : > { %v872_v15 = vmul.f32 0.5, %v834_v13  ;;  %1346 = vst [vmem:[%s2169_s22 + $0x8] sm:$0xff] %v834_v13  ;;  %v788_v16 = vadd.f32 %v787_v14, %v2150_v1 }
 0x147   : > { %v889_v17 = vmul.f32 1.442695, %v872_v15  ;;  %1331 = vst [vmem:[%s2159_s19 + $0x10] sm:$0xff] %v788_v16  ;;  %v1790_v19 = vpop.eup %1789 }
 0x148   : > { %v935_v26 = vmul.f32 %v1790_v19, %v919_v21 }
 0x149   : > { %1791 = vpow2.f32 %v889_v17 }
 0x14a   : > { %v836_v18 = vpop.f32.mrf.mxu2  ;;  %v951_v31 = vadd.f32 %v935_v26, %v783_v4  ;;  %v924_v4 = vld [vmem:[%s2183_s24 + $0x28] sm:$0xff]  ;;  %v926_v26 = vld [vmem:[%s2183_s24 + $0x38] sm:$0xff] }
 0x14b   : > { %v837_v20 = vadd.f32 %v836_v18, %v2163_v5 }
 0x14c   : > { %v789_v22 = vpop.f32.mrf.mxu1 }
 0x14d   : > { %v873_v23 = vmul.f32 0.5, %v837_v20  ;;  %1347 = vst [vmem:[%s2169_s22 + $0x10] sm:$0xff] %v837_v20  ;;  %v790_v24 = vadd.f32 %v789_v22, %v2150_v1  ;;  %v925_v22 = vld [vmem:[%s2183_s24 + $0x30] sm:$0xff] }
 0x14f   : > { %v1792_v27 = vpop.eup %1791  ;;  %1332 = vst [vmem:[%s2159_s19 + $0x18] sm:$0xff] %v790_v24  ;;  %v891_v29 = vmul.f32 1.442695, %v873_v23 }
 0x150   : > { %v936_v28 = vmul.f32 %v1792_v27, %v920_v25 }
 0x151   : > { %1793 = vpow2.f32 %v891_v29 }
 0x152   : > { %v838_v30 = vpop.f32.mrf.mxu2  ;;  %v952_v32 = vadd.f32 %v936_v28, %v785_v10 }
 0x153   : > { %v839_v33 = vadd.f32 %v838_v30, %v2163_v5 }
 0x154   : > { %v792_v34 = vpop.f32.mrf.mxu1  ;;  %v967_v35 = vpack.c.bf16 %v952_v32, %v951_v31 }
 0x155   : > { %v874_v36 = vmul.f32 0.5, %v839_v33  ;;  %1348 = vst [vmem:[%s2169_s22 + $0x18] sm:$0xff] %v839_v33  ;;  %v793_v37 = vadd.f32 %v792_v34, %v2150_v1 }
 0x156   : > { %1051 = vmatmul.bf16.vlgmr.msrb.gmra.mxu3 %v967_v35 }
 0x157   : > { %v893_v38 = vmul.f32 1.442695, %v874_v36  ;;  %1333 = vst [vmem:[%s2159_s19 + $0x20] sm:$0xff] %v793_v37  ;;  %v1794_v40 = vpop.eup %1793 }
 0x158   : > { %v937_v47 = vmul.f32 %v1794_v40, %v921_v42 }
 0x159   : > { %1795 = vpow2.f32 %v893_v38 }
 0x15a   : > { %v841_v39 = vpop.f32.mrf.mxu2  ;;  %v953_v52 = vadd.f32 %v937_v47, %v788_v16  ;;  %v928_v47 = vld [vmem:[%s2183_s24 + $0x48] sm:$0xff] }
 0x15b   : > { %v842_v41 = vadd.f32 %v841_v39, %v2163_v5 }
 0x15c   : > { %v794_v43 = vpop.f32.mrf.mxu1 }
 0x15d   : > { %v875_v44 = vmul.f32 0.5, %v842_v41  ;;  %1349 = vst [vmem:[%s2169_s22 + $0x20] sm:$0xff] %v842_v41  ;;  %v795_v45 = vadd.f32 %v794_v43, %v2150_v1  ;;  %v927_v43 = vld [vmem:[%s2183_s24 + $0x40] sm:$0xff] }
 0x15f   : > { %v1796_v48 = vpop.eup %1795  ;;  %1334 = vst [vmem:[%s2159_s19 + $0x28] sm:$0xff] %v795_v45  ;;  %v895_v50 = vmul.f32 1.442695, %v875_v44 }
 0x160   : > { %v938_v49 = vmul.f32 %v1796_v48, %v922_v46 }
 0x161   : > { %1797 = vpow2.f32 %v895_v50 }
 0x162   : > { %v843_v51 = vpop.f32.mrf.mxu2  ;;  %v954_v53 = vadd.f32 %v938_v49, %v790_v24 }
 0x163   : > { %v844_v54 = vadd.f32 %v843_v51, %v2163_v5 }
 0x164   : > { %v797_v55 = vpop.f32.mrf.mxu1  ;;  %v968_v56 = vpack.c.bf16 %v954_v53, %v953_v52 }
 0x165   : > { %v876_v57 = vmul.f32 0.5, %v844_v54  ;;  %1350 = vst [vmem:[%s2169_s22 + $0x28] sm:$0xff] %v844_v54  ;;  %v798_v58 = vadd.f32 %v797_v55, %v2150_v1 }
 0x166   : > { %1056 = vmatmul.bf16.gmra.mxu3 %v968_v56 }
 0x167   : > { %v897_v59 = vmul.f32 1.442695, %v876_v57  ;;  %1335 = vst [vmem:[%s2159_s19 + $0x30] sm:$0xff] %v798_v58  ;;  %v1798_v61 = vpop.eup %1797 }
 0x168   : > { %v939_v6 = vmul.f32 %v1798_v61, %v923_v63 }
 0x169   : > { %1799 = vpow2.f32 %v897_v59 }
 0x16a   : > { %v846_v60 = vpop.f32.mrf.mxu2  ;;  %v955_v11 = vadd.f32 %v939_v6, %v793_v37  ;;  %v930_v6 = vld [vmem:[%s2183_s24 + $0x58] sm:$0xff] }
 0x16b   : > { %v847_v62 = vadd.f32 %v846_v60, %v2163_v5 }
 0x16c   : > { %v799_v0 = vpop.f32.mrf.mxu1 }
 0x16d   : > { %v877_v2 = vmul.f32 0.5, %v847_v62  ;;  %1351 = vst [vmem:[%s2169_s22 + $0x30] sm:$0xff] %v847_v62  ;;  %v800_v3 = vadd.f32 %v799_v0, %v2150_v1  ;;  %v929_v0 = vld [vmem:[%s2183_s24 + $0x50] sm:$0xff] }
 0x16f   : > { %v1800_v7 = vpop.eup %1799  ;;  %1336 = vst [vmem:[%s2159_s19 + $0x38] sm:$0xff] %v800_v3  ;;  %v899_v9 = vmul.f32 1.442695, %v877_v2 }
 0x170   : > { %v940_v8 = vmul.f32 %v1800_v7, %v924_v4 }
 0x171   : > { %1801 = vpow2.f32 %v899_v9 }
 0x172   : > { %v848_v10 = vpop.f32.mrf.mxu2  ;;  %v956_v12 = vadd.f32 %v940_v8, %v795_v45 }
 0x173   : > { %v849_v13 = vadd.f32 %v848_v10, %v2163_v5 }
 0x174   : > { %v802_v14 = vpop.f32.mrf.mxu1  ;;  %v969_v15 = vpack.c.bf16 %v956_v12, %v955_v11 }
 0x175   : > { %v878_v16 = vmul.f32 0.5, %v849_v13  ;;  %1352 = vst [vmem:[%s2169_s22 + $0x38] sm:$0xff] %v849_v13  ;;  %v803_v17 = vadd.f32 %v802_v14, %v2150_v1 }
 0x176   : > { %1061 = vmatmul.bf16.gmra.mxu3 %v969_v15 }
 0x177   : > { %v901_v18 = vmul.f32 1.442695, %v878_v16  ;;  %1337 = vst [vmem:[%s2159_s19 + $0x40] sm:$0xff] %v803_v17  ;;  %v1802_v20 = vpop.eup %1801 }
 0x178   : > { %v941_v27 = vmul.f32 %v1802_v20, %v925_v22 }
 0x179   : > { %1803 = vpow2.f32 %v901_v18 }
 0x17a   : > { %v851_v19 = vpop.f32.mrf.mxu2  ;;  %v957_v32 = vadd.f32 %v941_v27, %v798_v58  ;;  %v1751_v27 = vld [vmem:[%s2336_s8 + $0x28] sm:$0xff] }
 0x17b   : > { %v852_v21 = vadd.f32 %v851_v19, %v2163_v5  ;;  %v1753_v19 = vld [vmem:[%s2336_s8 + $0x38] sm:$0xff] }
 0x17c   : > { %v804_v23 = vpop.f32.mrf.mxu1  ;;  %1184 = vmatpush.bf16.msrb.mxu0 %v1753_v19 }
 0x17d   : > { %v879_v24 = vmul.f32 0.5, %v852_v21  ;;  %1353 = vst [vmem:[%s2169_s22 + $0x40] sm:$0xff] %v852_v21  ;;  %v805_v25 = vadd.f32 %v804_v23, %v2150_v1  ;;  %v1752_v21 = vld [vmem:[%s2336_s8 + $0x30] sm:$0xff] }
 0x17f   : > { %v1804_v28 = vpop.eup %1803  ;;  %1338 = vst [vmem:[%s2159_s19 + $0x48] sm:$0xff] %v805_v25  ;;  %v903_v30 = vmul.f32 1.442695, %v879_v24 }
 0x180   : > { %v942_v29 = vmul.f32 %v1804_v28, %v926_v26  ;;  %1185 = vmatpush.bf16.msrb.mxu0 %v1752_v21 }
 0x181   : > { %1805 = vpow2.f32 %v903_v30  ;;  %v932_v30 = vld [vmem:[%s2183_s24 + $0x68] sm:$0xff] }
 0x182   : > { %v853_v31 = vpop.f32.mrf.mxu2  ;;  %v958_v33 = vadd.f32 %v942_v29, %v800_v3 }
 0x183   : > { %v854_v34 = vadd.f32 %v853_v31, %v2163_v5 }
 0x184   : > { %v807_v35 = vpop.f32.mrf.mxu1  ;;  %v970_v36 = vpack.c.bf16 %v958_v33, %v957_v32  ;;  %1186 = vmatpush.bf16.msrb.mxu0 %v1751_v27 }
 0x185   : > { %v880_v37 = vmul.f32 0.5, %v854_v34  ;;  %1354 = vst [vmem:[%s2169_s22 + $0x48] sm:$0xff] %v854_v34  ;;  %v808_v38 = vadd.f32 %v807_v35, %v2150_v1  ;;  %v1750_v34 = vld [vmem:[%s2336_s8 + $0x20] sm:$0xff] }
 0x186   : > { %1066 = vmatmul.bf16.gmra.mxu3 %v970_v36 }
 0x187   : > { %v905_v39 = vmul.f32 1.442695, %v880_v37  ;;  %1339 = vst [vmem:[%s2159_s19 + $0x50] sm:$0xff] %v808_v38  ;;  %v1806_v41 = vpop.eup %1805 }
 0x188   : > { %v943_v48 = vmul.f32 %v1806_v41, %v927_v43  ;;  %1187 = vmatpush.bf16.msrb.mxu0 %v1750_v34 }
 0x189   : > { %1807 = vpow2.f32 %v905_v39 }
 0x18a   : > { %v856_v40 = vpop.f32.mrf.mxu2  ;;  %v959_v53 = vadd.f32 %v943_v48, %v803_v17 }
 0x18b   : > { %v857_v42 = vadd.f32 %v856_v40, %v2163_v5  ;;  %v1749_v40 = vld [vmem:[%s2336_s8 + $0x18] sm:$0xff] }
 0x18c   : > { %v809_v44 = vpop.f32.mrf.mxu1  ;;  %1188 = vmatpush.bf16.msrb.mxu0 %v1749_v40 }
 0x18d   : > { %v881_v45 = vmul.f32 0.5, %v857_v42  ;;  %1355 = vst [vmem:[%s2169_s22 + $0x50] sm:$0xff] %v857_v42  ;;  %v810_v46 = vadd.f32 %v809_v44, %v2150_v1  ;;  %v933_v44 = vld [vmem:[%s2183_s24 + $0x70] sm:$0xff] }
 0x18f   : > { %v1808_v49 = vpop.eup %1807  ;;  %1340 = vst [vmem:[%s2159_s19 + $0x58] sm:$0xff] %v810_v46  ;;  %v907_v51 = vmul.f32 1.442695, %v881_v45  ;;  %v1748_v45 = vld [vmem:[%s2336_s8 + $0x10] sm:$0xff] }
 0x190   : > { %v944_v50 = vmul.f32 %v1808_v49, %v928_v47  ;;  %1189 = vmatpush.bf16.msrb.mxu0 %v1748_v45 }
 0x191   : > { %1809 = vpow2.f32 %v907_v51 }
 0x192   : > { %v858_v52 = vpop.f32.mrf.mxu2  ;;  %v960_v54 = vadd.f32 %v944_v50, %v805_v25  ;;  %v931_v25 = vld [vmem:[%s2183_s24 + $0x60] sm:$0xff] }
 0x193   : > { %v859_v55 = vadd.f32 %v858_v52, %v2163_v5  ;;  %v1746_v52 = vld [vmem:[%s2336_s8] sm:$0xff] }
 0x194   : > { %v812_v56 = vpop.f32.mrf.mxu1  ;;  %v971_v57 = vpack.c.bf16 %v960_v54, %v959_v53 }
 0x195   : > { %v882_v58 = vmul.f32 0.5, %v859_v55  ;;  %1356 = vst [vmem:[%s2169_s22 + $0x58] sm:$0xff] %v859_v55  ;;  %v813_v59 = vadd.f32 %v812_v56, %v2150_v1  ;;  %v1787_v55 = vld [vmem:[%s2335_s7] ss:$0 sm:$0xff] }
 0x196   : > { %1071 = vmatmul.bf16.gmra.mxu3 %v971_v57 }
 0x197   : > { %v909_v60 = vmul.f32 1.442695, %v882_v58  ;;  %1341 = vst [vmem:[%s2159_s19 + $0x60] sm:$0xff] %v813_v59  ;;  %v1810_v62 = vpop.eup %1809 }
 0x198   : > { %v945_v7 = vmul.f32 %v1810_v62, %v929_v0 }
 0x199   : > { %1811 = vpow2.f32 %v909_v60 }
 0x19a   : > { %v861_v61 = vpop.f32.mrf.mxu2  ;;  %v961_v12 = vadd.f32 %v945_v7, %v808_v38 }
 0x19b   : > { %v862_v63 = vadd.f32 %v861_v61, %v2163_v5 }
 0x19c   : > { %v814_v2 = vpop.f32.mrf.mxu1 }
 0x19d   : > { %v883_v3 = vmul.f32 0.5, %v862_v63  ;;  %1357 = vst [vmem:[%s2169_s22 + $0x60] sm:$0xff] %v862_v63  ;;  %v815_v4 = vadd.f32 %v814_v2, %v2150_v1 }
 0x19f   : > { %v1812_v8 = vpop.eup %1811  ;;  %1342 = vst [vmem:[%s2159_s19 + $0x68] sm:$0xff] %v815_v4  ;;  %v911_v10 = vmul.f32 1.442695, %v883_v3 }
 0x1a0   : > { %v946_v9 = vmul.f32 %v1812_v8, %v930_v6 }
 0x1a1   : > { %1813 = vpow2.f32 %v911_v10 }
 0x1a2   : > { %v863_v11 = vpop.f32.mrf.mxu2  ;;  %v962_v13 = vadd.f32 %v946_v9, %v810_v46  ;;  %v1747_v46 = vld [vmem:[%s2336_s8 + $0x8] sm:$0xff] }
 0x1a3   : > { %v864_v14 = vadd.f32 %v863_v11, %v2163_v5  ;;  %1190 = vmatpush.bf16.msrb.mxu0 %v1747_v46 }
 0x1a4   : > { %v817_v15 = vpop.f32.mrf.mxu1  ;;  %v972_v16 = vpack.c.bf16 %v962_v13, %v961_v12 }
 0x1a5   : > { %v884_v17 = vmul.f32 0.5, %v864_v14  ;;  %1358 = vst [vmem:[%s2169_s22 + $0x68] sm:$0xff] %v864_v14  ;;  %v818_v18 = vadd.f32 %v817_v15, %v2150_v1 }
 0x1a6   : > { %1076 = vmatmul.bf16.gmra.mxu3 %v972_v16 }
 0x1a7   : > { %v913_v20 = vmul.f32 1.442695, %v884_v17  ;;  %1343 = vst [vmem:[%s2159_s19 + $0x70] sm:$0xff] %v818_v18  ;;  %v1814_v23 = vpop.eup %1813  ;;  %1191 = vmatpush.bf16.msrb.mxu0 %v1746_v52 }
 0x1a8   : > { %v947_v31 = vmul.f32 %v1814_v23, %v931_v25 }
 0x1a9   : > { %1815 = vpow2.f32 %v913_v20 }
 0x1aa   : > { %v866_v22 = vpop.f32.mrf.mxu2  ;;  %v963_v37 = vadd.f32 %v947_v31, %v813_v59 }
 0x1ab   : > { %v867_v24 = vadd.f32 %v866_v22, %v2163_v5 }
 0x1ac   : > { %v819_v26 = vpop.f32.mrf.mxu1 }
 0x1ad   : > { %v885_v28 = vmul.f32 0.5, %v867_v24  ;;  %1359 = vst [vmem:[%s2169_s22 + $0x70] sm:$0xff] %v867_v24  ;;  %v820_v29 = vadd.f32 %v819_v26, %v2150_v1 }
 0x1af   : > { %v1816_v32 = vpop.eup %1815  ;;  %1344 = vst [vmem:[%s2159_s19 + $0x78] sm:$0xff] %v820_v29  ;;  %v915_v35 = vmul.f32 1.442695, %v885_v28 }
 0x1b0   : > { %v948_v33 = vmul.f32 %v1816_v32, %v932_v30 }
 0x1b1   : > { %1817 = vpow2.f32 %v915_v35 }
 0x1b2   : > { %v868_v36 = vpop.f32.mrf.mxu2  ;;  %v964_v38 = vadd.f32 %v948_v33, %v815_v4 }
 0x1b3   : > { %v869_v39 = vadd.f32 %v868_v36, %v2163_v5  ;;  %v934_v5 = vld [vmem:[%s2183_s24 + $0x78] sm:$0xff] }
 0x1b4   : > { %v973_v1 = vpack.c.bf16 %v964_v38, %v963_v37 }
 0x1b5   : > { %v886_v41 = vmul.f32 0.5, %v869_v39  ;;  %1360 = vst [vmem:[%s2169_s22 + $0x78] sm:$0xff] %v869_v39 }
 0x1b6   : > { %1081 = vmatmul.bf16.gmra.mxu3 %v973_v1 }
 0x1b7   : > { %v917_v42 = vmul.f32 1.442695, %v886_v41  ;;  %v1818_v43 = vpop.eup %1817 }
 0x1b8   : > { %v949_v47 = vmul.f32 %v1818_v43, %v933_v44 }
 0x1b9   : > { %1819 = vpow2.f32 %v917_v42 }
 0x1ba   : > { %v965_v50 = vadd.f32 %v949_v47, %v818_v18  ;;  %v2285_v47 = vld [vmem:[%s2337_s9] ss:$0 sm:$0xff] }
 0x1bf   : > { %v1820_v48 = vpop.eup %1819 }
 0x1c0   : > { %v950_v49 = vmul.f32 %v1820_v48, %v934_v5 }
 0x1c2   : > { %v966_v51 = vadd.f32 %v950_v49, %v820_v29 }
 0x1c4   : > { %v974_v53 = vpack.c.bf16 %v966_v51, %v965_v50 }
 0x1c6   : > { %1086 = vmatmul.bf16.gmra.mxu3 %v974_v53 }
 0x1d9   : > { %v1052_v54 = vpop.f32.mrf.mxu3 }
 0x1da   : > { %v1053_v56 = vadd.f32 %v1787_v55, %v1052_v54 }
 0x1dc   : > { %v1092_v59 = vmax.f32 %v1053_v56, 0.0 }
 0x1e1   : > { %v1054_v57 = vpop.f32.mrf.mxu3 }
 0x1e2   : > { %v1055_v58 = vadd.f32 %v1787_v55, %v1054_v57 }
 0x1e4   : > { %v1093_v60 = vmax.f32 %v1055_v58, 0.0 }
 0x1e6   : > { %v1108_v61 = vpack.c.bf16 %v1093_v60, %v1092_v59 }
 0x1e8   : > { %1192 = vmatmul.bf16.vlgmr.msrb.gmra.mxu0 %v1108_v61 }
 0x1e9   : > { %v1057_v62 = vpop.f32.mrf.mxu3 }
 0x1ea   : > { %v1058_v63 = vadd.f32 %v1787_v55, %v1057_v62 }
 0x1ec   : > { %v1094_v3 = vmax.f32 %v1058_v63, 0.0 }
 0x1f1   : > { %v1059_v0 = vpop.f32.mrf.mxu3 }
 0x1f2   : > { %v1060_v2 = vadd.f32 %v1787_v55, %v1059_v0 }
 0x1f4   : > { %v1095_v4 = vmax.f32 %v1060_v2, 0.0 }
 0x1f6   : > { %v1109_v6 = vpack.c.bf16 %v1095_v4, %v1094_v3 }
 0x1f8   : > { %1197 = vmatmul.bf16.gmra.mxu0 %v1109_v6 }
 0x1f9   : > { %v1062_v7 = vpop.f32.mrf.mxu3 }
 0x1fa   : > { %v1063_v8 = vadd.f32 %v1787_v55, %v1062_v7 }
 0x1fc   : > { %v1096_v11 = vmax.f32 %v1063_v8, 0.0 }
 0x201   : > { %v1064_v9 = vpop.f32.mrf.mxu3 }
 0x202   : > { %v1065_v10 = vadd.f32 %v1787_v55, %v1064_v9 }
 0x204   : > { %v1097_v12 = vmax.f32 %v1065_v10, 0.0 }
 0x206   : > { %v1110_v13 = vpack.c.bf16 %v1097_v12, %v1096_v11 }
 0x208   : > { %1202 = vmatmul.bf16.gmra.mxu0 %v1110_v13 }
 0x209   : > { %v1067_v14 = vpop.f32.mrf.mxu3 }
 0x20a   : > { %v1068_v15 = vadd.f32 %v1787_v55, %v1067_v14 }
 0x20c   : > { %v1098_v18 = vmax.f32 %v1068_v15, 0.0 }
 0x211   : > { %v1069_v16 = vpop.f32.mrf.mxu3 }
 0x212   : > { %v1070_v17 = vadd.f32 %v1787_v55, %v1069_v16 }
 0x214   : > { %v1099_v19 = vmax.f32 %v1070_v17, 0.0 }
 0x216   : > { %v1111_v20 = vpack.c.bf16 %v1099_v19, %v1098_v18 }
 0x218   : > { %1207 = vmatmul.bf16.gmra.mxu0 %v1111_v20 }
 0x219   : > { %v1072_v21 = vpop.f32.mrf.mxu3 }
 0x21a   : > { %v1073_v22 = vadd.f32 %v1787_v55, %v1072_v21 }
 0x21c   : > { %v1100_v25 = vmax.f32 %v1073_v22, 0.0 }
 0x221   : > { %v1074_v23 = vpop.f32.mrf.mxu3 }
 0x222   : > { %v1075_v24 = vadd.f32 %v1787_v55, %v1074_v23 }
 0x224   : > { %v1101_v26 = vmax.f32 %v1075_v24, 0.0 }
 0x226   : > { %v1112_v27 = vpack.c.bf16 %v1101_v26, %v1100_v25 }
 0x228   : > { %1212 = vmatmul.bf16.gmra.mxu0 %v1112_v27 }
 0x229   : > { %v1077_v28 = vpop.f32.mrf.mxu3 }
 0x22a   : > { %v1078_v29 = vadd.f32 %v1787_v55, %v1077_v28 }
 0x22c   : > { %v1102_v32 = vmax.f32 %v1078_v29, 0.0 }
 0x231   : > { %v1079_v30 = vpop.f32.mrf.mxu3 }
 0x232   : > { %v1080_v31 = vadd.f32 %v1787_v55, %v1079_v30 }
 0x234   : > { %v1103_v33 = vmax.f32 %v1080_v31, 0.0 }
 0x236   : > { %v1113_v34 = vpack.c.bf16 %v1103_v33, %v1102_v32 }
 0x238   : > { %1217 = vmatmul.bf16.gmra.mxu0 %v1113_v34 }
 0x239   : > { %v1082_v35 = vpop.f32.mrf.mxu3 }
 0x23a   : > { %v1083_v36 = vadd.f32 %v1787_v55, %v1082_v35 }
 0x23c   : > { %v1104_v39 = vmax.f32 %v1083_v36, 0.0 }
 0x241   : > { %v1084_v37 = vpop.f32.mrf.mxu3 }
 0x242   : > { %v1085_v38 = vadd.f32 %v1787_v55, %v1084_v37 }
 0x244   : > { %v1105_v1 = vmax.f32 %v1085_v38, 0.0 }
 0x246   : > { %v1114_v40 = vpack.c.bf16 %v1105_v1, %v1104_v39 }
 0x248   : > { %1222 = vmatmul.bf16.gmra.mxu0 %v1114_v40 }
 0x249   : > { %v1087_v41 = vpop.f32.mrf.mxu3 }
 0x24a   : > { %v1088_v42 = vadd.f32 %v1787_v55, %v1087_v41 }
 0x24c   : > { %v1106_v45 = vmax.f32 %v1088_v42, 0.0 }
 0x251   : > { %v1089_v43 = vpop.f32.mrf.mxu3 }
 0x252   : > { %v1090_v44 = vadd.f32 %v1787_v55, %v1089_v43 }
 0x254   : > { %v1107_v5 = vmax.f32 %v1090_v44, 0.0 }
 0x256   : > { %v1115_v46 = vpack.c.bf16 %v1107_v5, %v1106_v45 }
 0x258   : > { %1227 = vmatmul.bf16.gmra.mxu0 %v1115_v46 }
 0x265   : > { %v1193_v48 = vpop.f32.mrf.mxu0 }
 0x266   : > { %v1194_v49 = vadd.f32 %v2285_v47, %v1193_v48 }
 0x268   : > { %v1233_v50 = vsub.f32 0.0, %v1194_v49 }
 0x26a   : > { %v1249_v51 = vmul.f32 1.442695, %v1233_v50 }
 0x26c   : > { %1821 = vpow2.f32 %v1249_v51 }
 0x26d   : > { %v1195_v52 = vpop.f32.mrf.mxu0 }
 0x26e   : > { %v1196_v53 = vadd.f32 %v2285_v47, %v1195_v52 }
 0x270   : > { %v1234_v54 = vsub.f32 0.0, %v1196_v53 }
 0x272   : > { %v1822_v55 = vpop.eup %1821  ;;  %v1251_v56 = vmul.f32 1.442695, %v1234_v54 }
 0x273   : > { %v1281_v57 = vadd.f32 1.0, %v1822_v55 }
 0x274   : > { %1823 = vpow2.f32 %v1251_v56 }
 0x275   : > { %1825 = vrcp.f32 %v1281_v57  ;;  %v1198_v58 = vpop.f32.mrf.mxu0 }
 0x276   : > { %v1199_v59 = vadd.f32 %v2285_v47, %v1198_v58 }
 0x278   : > { %v1235_v60 = vsub.f32 0.0, %v1199_v59 }
 0x27a   : > { %v1824_v61 = vpop.eup %1823  ;;  %v1253_v62 = vmul.f32 1.442695, %v1235_v60 }
 0x27b   : > { %v1826_v63 = vpop.eup %1825  ;;  %v1282_v0 = vadd.f32 1.0, %v1824_v61 }
 0x27c   : > { %1313 = vst [vmem:[%s2294_s16] sm:$0xff] %v1826_v63  ;;  %1827 = vpow2.f32 %v1253_v62 }
 0x27d   : > { %1829 = vrcp.f32 %v1282_v0  ;;  %v1200_v2 = vpop.f32.mrf.mxu0 }
 0x27e   : > { %v1201_v3 = vadd.f32 %v2285_v47, %v1200_v2 }
 0x280   : > { %v1236_v4 = vsub.f32 0.0, %v1201_v3 }
 0x282   : > { %v1828_v6 = vpop.eup %1827  ;;  %v1255_v7 = vmul.f32 1.442695, %v1236_v4 }
 0x283   : > { %v1830_v8 = vpop.eup %1829  ;;  %v1283_v9 = vadd.f32 1.0, %v1828_v6 }
 0x284   : > { %1314 = vst [vmem:[%s2294_s16 + $0x8] sm:$0xff] %v1830_v8  ;;  %1831 = vpow2.f32 %v1255_v7 }
 0x285   : > { %1833 = vrcp.f32 %v1283_v9  ;;  %v1203_v10 = vpop.f32.mrf.mxu0 }
 0x286   : > { %v1204_v11 = vadd.f32 %v2285_v47, %v1203_v10 }
 0x288   : > { %v1237_v12 = vsub.f32 0.0, %v1204_v11 }
 0x28a   : > { %v1832_v13 = vpop.eup %1831  ;;  %v1257_v14 = vmul.f32 1.442695, %v1237_v12 }
 0x28b   : > { %v1834_v15 = vpop.eup %1833  ;;  %v1284_v16 = vadd.f32 1.0, %v1832_v13 }
 0x28c   : > { %1315 = vst [vmem:[%s2294_s16 + $0x10] sm:$0xff] %v1834_v15  ;;  %1835 = vpow2.f32 %v1257_v14 }
 0x28d   : > { %1837 = vrcp.f32 %v1284_v16  ;;  %v1205_v17 = vpop.f32.mrf.mxu0 }
 0x28e   : > { %v1206_v18 = vadd.f32 %v2285_v47, %v1205_v17 }
 0x290   : > { %v1238_v19 = vsub.f32 0.0, %v1206_v18 }
 0x292   : > { %v1836_v20 = vpop.eup %1835  ;;  %v1259_v21 = vmul.f32 1.442695, %v1238_v19 }
 0x293   : > { %v1838_v22 = vpop.eup %1837  ;;  %v1285_v23 = vadd.f32 1.0, %v1836_v20 }
 0x294   : > { %1316 = vst [vmem:[%s2294_s16 + $0x18] sm:$0xff] %v1838_v22  ;;  %1839 = vpow2.f32 %v1259_v21 }
 0x295   : > { %1841 = vrcp.f32 %v1285_v23  ;;  %v1208_v24 = vpop.f32.mrf.mxu0 }
 0x296   : > { %v1209_v25 = vadd.f32 %v2285_v47, %v1208_v24 }
 0x298   : > { %v1239_v26 = vsub.f32 0.0, %v1209_v25 }
 0x29a   : > { %v1840_v27 = vpop.eup %1839  ;;  %v1261_v28 = vmul.f32 1.442695, %v1239_v26 }
 0x29b   : > { %v1842_v29 = vpop.eup %1841  ;;  %v1286_v30 = vadd.f32 1.0, %v1840_v27 }
 0x29c   : > { %1317 = vst [vmem:[%s2294_s16 + $0x20] sm:$0xff] %v1842_v29  ;;  %1843 = vpow2.f32 %v1261_v28 }
 0x29d   : > { %1845 = vrcp.f32 %v1286_v30  ;;  %v1210_v31 = vpop.f32.mrf.mxu0 }
 0x29e   : > { %v1211_v32 = vadd.f32 %v2285_v47, %v1210_v31 }
 0x2a0   : > { %v1240_v33 = vsub.f32 0.0, %v1211_v32 }
 0x2a2   : > { %v1844_v34 = vpop.eup %1843  ;;  %v1263_v35 = vmul.f32 1.442695, %v1240_v33 }
 0x2a3   : > { %v1846_v36 = vpop.eup %1845  ;;  %v1287_v37 = vadd.f32 1.0, %v1844_v34 }
 0x2a4   : > { %1318 = vst [vmem:[%s2294_s16 + $0x28] sm:$0xff] %v1846_v36  ;;  %1847 = vpow2.f32 %v1263_v35 }
 0x2a5   : > { %1849 = vrcp.f32 %v1287_v37  ;;  %v1213_v38 = vpop.f32.mrf.mxu0 }
 0x2a6   : > { %v1214_v39 = vadd.f32 %v2285_v47, %v1213_v38 }
 0x2a8   : > { %v1241_v1 = vsub.f32 0.0, %v1214_v39 }
 0x2aa   : > { %v1848_v40 = vpop.eup %1847  ;;  %v1265_v41 = vmul.f32 1.442695, %v1241_v1 }
 0x2ab   : > { %v1850_v42 = vpop.eup %1849  ;;  %v1288_v43 = vadd.f32 1.0, %v1848_v40 }
 0x2ac   : > { %1319 = vst [vmem:[%s2294_s16 + $0x30] sm:$0xff] %v1850_v42  ;;  %1851 = vpow2.f32 %v1265_v41 }
 0x2ad   : > { %1853 = vrcp.f32 %v1288_v43  ;;  %v1215_v44 = vpop.f32.mrf.mxu0 }
 0x2ae   : > { %v1216_v45 = vadd.f32 %v2285_v47, %v1215_v44 }
 0x2b0   : > { %v1242_v5 = vsub.f32 0.0, %v1216_v45 }
 0x2b2   : > { %v1852_v46 = vpop.eup %1851  ;;  %v1267_v48 = vmul.f32 1.442695, %v1242_v5 }
 0x2b3   : > { %v1854_v49 = vpop.eup %1853  ;;  %v1289_v50 = vadd.f32 1.0, %v1852_v46 }
 0x2b4   : > { %1320 = vst [vmem:[%s2294_s16 + $0x38] sm:$0xff] %v1854_v49  ;;  %1855 = vpow2.f32 %v1267_v48 }
 0x2b5   : > { %1857 = vrcp.f32 %v1289_v50  ;;  %v1218_v51 = vpop.f32.mrf.mxu0 }
 0x2b6   : > { %v1219_v52 = vadd.f32 %v2285_v47, %v1218_v51 }
 0x2b8   : > { %v1243_v53 = vsub.f32 0.0, %v1219_v52 }
 0x2ba   : > { %v1856_v54 = vpop.eup %1855  ;;  %v1269_v55 = vmul.f32 1.442695, %v1243_v53 }
 0x2bb   : > { %v1858_v56 = vpop.eup %1857  ;;  %v1290_v57 = vadd.f32 1.0, %v1856_v54 }
 0x2bc   : > { %1321 = vst [vmem:[%s2294_s16 + $0x40] sm:$0xff] %v1858_v56  ;;  %1859 = vpow2.f32 %v1269_v55 }
 0x2bd   : > { %1861 = vrcp.f32 %v1290_v57  ;;  %v1220_v58 = vpop.f32.mrf.mxu0 }
 0x2be   : > { %v1221_v59 = vadd.f32 %v2285_v47, %v1220_v58 }
 0x2c0   : > { %v1244_v60 = vsub.f32 0.0, %v1221_v59 }
 0x2c2   : > { %v1860_v61 = vpop.eup %1859  ;;  %v1271_v62 = vmul.f32 1.442695, %v1244_v60 }
 0x2c3   : > { %v1862_v63 = vpop.eup %1861  ;;  %v1291_v0 = vadd.f32 1.0, %v1860_v61 }
 0x2c4   : > { %1322 = vst [vmem:[%s2294_s16 + $0x48] sm:$0xff] %v1862_v63  ;;  %1863 = vpow2.f32 %v1271_v62 }
 0x2c5   : > { %1865 = vrcp.f32 %v1291_v0  ;;  %v1223_v2 = vpop.f32.mrf.mxu0 }
 0x2c6   : > { %v1224_v3 = vadd.f32 %v2285_v47, %v1223_v2 }
 0x2c8   : > { %v1245_v4 = vsub.f32 0.0, %v1224_v3 }
 0x2ca   : > { %v1864_v6 = vpop.eup %1863  ;;  %v1273_v7 = vmul.f32 1.442695, %v1245_v4 }
 0x2cb   : > { %v1866_v8 = vpop.eup %1865  ;;  %v1292_v9 = vadd.f32 1.0, %v1864_v6 }
 0x2cc   : > { %1323 = vst [vmem:[%s2294_s16 + $0x50] sm:$0xff] %v1866_v8  ;;  %1867 = vpow2.f32 %v1273_v7 }
 0x2cd   : > { %1869 = vrcp.f32 %v1292_v9  ;;  %v1225_v10 = vpop.f32.mrf.mxu0 }
 0x2ce   : > { %v1226_v11 = vadd.f32 %v2285_v47, %v1225_v10 }
 0x2d0   : > { %v1246_v12 = vsub.f32 0.0, %v1226_v11 }
 0x2d2   : > { %v1868_v13 = vpop.eup %1867  ;;  %v1275_v14 = vmul.f32 1.442695, %v1246_v12 }
 0x2d3   : > { %v1870_v15 = vpop.eup %1869  ;;  %v1293_v16 = vadd.f32 1.0, %v1868_v13 }
 0x2d4   : > { %1324 = vst [vmem:[%s2294_s16 + $0x58] sm:$0xff] %v1870_v15  ;;  %1871 = vpow2.f32 %v1275_v14 }
 0x2d5   : > { %1873 = vrcp.f32 %v1293_v16  ;;  %v1228_v17 = vpop.f32.mrf.mxu0 }
 0x2d6   : > { %v1229_v18 = vadd.f32 %v2285_v47, %v1228_v17 }
 0x2d8   : > { %v1247_v19 = vsub.f32 0.0, %v1229_v18 }
 0x2da   : > { %v1872_v20 = vpop.eup %1871  ;;  %v1277_v21 = vmul.f32 1.442695, %v1247_v19 }
 0x2db   : > { %v1874_v22 = vpop.eup %1873  ;;  %v1294_v23 = vadd.f32 1.0, %v1872_v20 }
 0x2dc   : > { %1325 = vst [vmem:[%s2294_s16 + $0x60] sm:$0xff] %v1874_v22  ;;  %1875 = vpow2.f32 %v1277_v21 }
 0x2dd   : > { %1877 = vrcp.f32 %v1294_v23  ;;  %v1230_v24 = vpop.f32.mrf.mxu0 }
 0x2de   : > { %v1231_v25 = vadd.f32 %v2285_v47, %v1230_v24 }
 0x2e0   : > { %v1248_v26 = vsub.f32 0.0, %v1231_v25 }
 0x2e2   : > { %v1876_v27 = vpop.eup %1875  ;;  %v1279_v28 = vmul.f32 1.442695, %v1248_v26 }
 0x2e3   : > { %v1878_v29 = vpop.eup %1877  ;;  %v1295_v30 = vadd.f32 1.0, %v1876_v27 }
 0x2e4   : > { %1326 = vst [vmem:[%s2294_s16 + $0x68] sm:$0xff] %v1878_v29  ;;  %1879 = vpow2.f32 %v1279_v28 }
 0x2e5   : > { %1881 = vrcp.f32 %v1295_v30 }
 0x2ea   : > { %v1880_v31 = vpop.eup %1879 }
 0x2eb   : > { %v1882_v32 = vpop.eup %1881  ;;  %v1296_v33 = vadd.f32 1.0, %v1880_v31 }
 0x2ec   : > { %1327 = vst [vmem:[%s2294_s16 + $0x70] sm:$0xff] %v1882_v32 }
 0x2ed   : > { %1883 = vrcp.f32 %v1296_v33 }
 0x2f3   : > { %v1884_v34 = vpop.eup %1883 }
 0x2f4   : > { %1328 = vst [vmem:[%s2294_s16 + $0x78] sm:$0xff] %v1884_v34 }
 0x2f5 PF: > { %s23_s21 = sadd.s32 1, %s1891_s21  }
 0x2f6   : > { %p20_p4 = scmp.ge.s32.totalorder %s23_s21, 4  }
 0x2f8   :  { %22 = sbr.rel (!%p20_p4) target bundleno = 1 (0x1), region = 117 }

</bundles_post_ra>
